<compile_context>
chip_gen: v7x
topology: tpu7x:2x2x1
jax: 0.10.0
libtpu: 0.0.40
codegen_flags: <defaults>
</compile_context>

<pallas_src>
import jax
import jax.numpy as jnp
from jax.experimental import pallas as pl
from jax.experimental.pallas import tpu as pltpu


def _mlp_kernel(x_ref, w1_ref, b1_ref, w2_ref, b2_ref, w3_ref, b3_ref, o_ref):
    # fc1 + relu
    h1 = jnp.dot(x_ref[...], w1_ref[...], preferred_element_type=jnp.float32)
    h1 = jnp.maximum(h1 + b1_ref[...], 0.0)
    # dropout(p=0.5) in eval mode == identity
    # fc2 + relu
    h2 = jnp.dot(h1, w2_ref[...], preferred_element_type=jnp.float32)
    h2 = jnp.maximum(h2 + b2_ref[...], 0.0)
    # fc3 (no activation)
    out = jnp.dot(h2, w3_ref[...], preferred_element_type=jnp.float32)
    o_ref[...] = (out + b3_ref[...]).astype(o_ref.dtype)


def _choose_tile(B, max_tm=1024):
    """Pick a batch tile (multiple of 8) and the padded batch size.

    Prefers >=2 grid steps (both v7x TensorCores busy) while keeping the tile
    as large as possible (<= max_tm) to amortize per-grid-step overhead.
    """
    b8 = -(-B // 8) * 8                     # round up to sublane multiple
    if b8 <= 8:
        tm = 8
    elif b8 <= 2 * max_tm:
        half = -(-b8 // 2)
        tm = -(-half // 8) * 8              # ~half the batch, multiple of 8
    else:
        tm = max_tm
    b_pad = -(-b8 // tm) * tm               # padded batch: multiple of tm
    return tm, b_pad


def net_forward(x, params, *, max_tm=1024):
    """x: (B, 6) float32. params: dict of transposed weights/biases."""
    B, d_in = x.shape
    assert d_in == 6
    w1, b1 = params["w1"], params["b1"]   # (6, 64), (1, 64)
    w2, b2 = params["w2"], params["b2"]   # (64, 32), (1, 32)
    w3, b3 = params["w3"], params["b3"]   # (32, 3),  (1, 3)

    tm, b_pad = _choose_tile(B, max_tm)
    if b_pad != B:
        x = jnp.pad(x, ((0, b_pad - B), (0, 0)))

    grid = (b_pad // tm,)
    full = lambda shape: pl.BlockSpec(shape, lambda i: (0, 0))

    weight_bytes = 4 * (6 * 64 + 64 + 64 * 32 + 32 + 32 * 3 + 3)
    cost = pl.CostEstimate(
        flops=2 * b_pad * (6 * 64 + 64 * 32 + 32 * 3),
        transcendentals=0,
        bytes_accessed=b_pad * (6 + 3) * 4 + weight_bytes,
    )

    out = pl.pallas_call(
        _mlp_kernel,
        out_shape=jax.ShapeDtypeStruct((b_pad, 3), jnp.float32),
        grid_spec=pltpu.PrefetchScalarGridSpec(
            num_scalar_prefetch=0,
            grid=grid,
            in_specs=[
                pl.BlockSpec((tm, 6), lambda i: (i, 0)),   # x tile over batch
                full(w1.shape), full(b1.shape),
                full(w2.shape), full(b2.shape),
                full(w3.shape), full(b3.shape),
            ],
            out_specs=pl.BlockSpec((tm, 3), lambda i: (i, 0)),
        ),
        compiler_params=pltpu.CompilerParams(
            dimension_semantics=("parallel",),
        ),
        cost_estimate=cost,
    )(x, w1, b1, w2, b2, w3, b3)

    return out[:B] if b_pad != B else out


def init_params(key):
    """Deterministic init. PyTorch Linear weight is (out, in); we store (in, out)."""
    def linear(key, fan_in, fan_out):
        kw, kb = jax.random.split(key)
        bound = 1.0 / jnp.sqrt(fan_in)
        w = jax.random.uniform(kw, (fan_in, fan_out), jnp.float32, -bound, bound)
        b = jax.random.uniform(kb, (1, fan_out), jnp.float32, -bound, bound)
        return w, b

    k1, k2, k3 = jax.random.split(key, 3)
    w1, b1 = linear(k1, 6, 64)
    w2, b2 = linear(k2, 64, 32)
    w3, b3 = linear(k3, 32, 3)
    return {"w1": w1, "b1": b1, "w2": w2, "b2": b2, "w3": w3, "b3": b3}


def net_forward_ref(x, p):
    h1 = jnp.maximum(x @ p["w1"] + p["b1"], 0.0)
    h2 = jnp.maximum(h1 @ p["w2"] + p["b2"], 0.0)
    return h2 @ p["w3"] + p["b3"]


if __name__ == "__main__":
    key = jax.random.PRNGKey(0)
    kx, kp = jax.random.split(key)

    # Small, deterministic test: non-multiple-of-8 batch exercises the padding
    # path and still produces a 2-step "parallel" grid.
    B = 10
    x = jax.random.normal(kx, (B, 6), jnp.float32)
    params = init_params(kp)

    out = net_forward(x, params)
    out = jax.block_until_ready(out)

    ref = net_forward_ref(x, params)
    assert out.shape == (B, 3)
    assert jnp.allclose(out, ref, atol=1e-5, rtol=1e-5), "mismatch vs reference"

    print("KERNEL_OK")
</pallas_src>

<mosaic_0001>
module attributes {stable_mosaic.version = 11 : i64} {
  func.func @_mlp_kernel(%arg0: i32, %arg1: memref<8x6xf32, #tpu.memory_space<vmem>>, %arg2: memref<6x64xf32, #tpu.memory_space<vmem>>, %arg3: memref<1x64xf32, #tpu.memory_space<vmem>>, %arg4: memref<64x32xf32, #tpu.memory_space<vmem>>, %arg5: memref<1x32xf32, #tpu.memory_space<vmem>>, %arg6: memref<32x3xf32, #tpu.memory_space<vmem>>, %arg7: memref<1x3xf32, #tpu.memory_space<vmem>>, %arg8: memref<8x3xf32, #tpu.memory_space<vmem>>) attributes {dimension_semantics = [#tpu.dimension_semantics<parallel>], iteration_bounds = array<i64: 2>, scalar_prefetch = 0 : i64, scratch_operands = 0 : i64, tpu.core_type = #tpu.core_type<tc>, window_params = [{transform_indices = @transform_0, window_bounds = array<i64: 8, 6>}, {pipeline_mode = #tpu.pipeline_mode<synchronous>, transform_indices = @transform_1, window_bounds = array<i64: 6, 64>}, {pipeline_mode = #tpu.pipeline_mode<synchronous>, transform_indices = @transform_2, window_bounds = array<i64: 1, 64>}, {pipeline_mode = #tpu.pipeline_mode<synchronous>, transform_indices = @transform_3, window_bounds = array<i64: 64, 32>}, {pipeline_mode = #tpu.pipeline_mode<synchronous>, transform_indices = @transform_4, window_bounds = array<i64: 1, 32>}, {pipeline_mode = #tpu.pipeline_mode<synchronous>, transform_indices = @transform_5, window_bounds = array<i64: 32, 3>}, {pipeline_mode = #tpu.pipeline_mode<synchronous>, transform_indices = @transform_6, window_bounds = array<i64: 1, 3>}, {transform_indices = @transform_7, window_bounds = array<i64: 8, 3>}]} {
    %c0 = arith.constant 0 : index
    %c0_0 = arith.constant 0 : index
    %0 = vector.load %arg1[%c0, %c0_0] : memref<8x6xf32, #tpu.memory_space<vmem>>, vector<8x6xf32>
    %c0_1 = arith.constant 0 : index
    %c0_2 = arith.constant 0 : index
    %1 = vector.load %arg2[%c0_1, %c0_2] : memref<6x64xf32, #tpu.memory_space<vmem>>, vector<6x64xf32>
    %cst = arith.constant dense<0.000000e+00> : vector<8x64xf32>
    %2 = tpu.matmul %0, %1, %cst {dimension_numbers = #tpu.dot_dimension_numbers<[1], [0], [0], [1], [0, 0, 1, 1], [], []>} : vector<8x6xf32>, vector<6x64xf32>, vector<8x64xf32> -> vector<8x64xf32>
    %c0_3 = arith.constant 0 : index
    %c0_4 = arith.constant 0 : index
    %3 = vector.load %arg3[%c0_3, %c0_4] : memref<1x64xf32, #tpu.memory_space<vmem>>, vector<1x64xf32>
    %4 = vector.broadcast %3 : vector<1x64xf32> to vector<8x64xf32>
    %5 = arith.addf %2, %4 : vector<8x64xf32>
    %cst_5 = arith.constant 0.000000e+00 : f32
    %6 = vector.broadcast %cst_5 : f32 to vector<8x64xf32>
    %7 = arith.maximumf %5, %6 : vector<8x64xf32>
    %c0_6 = arith.constant 0 : index
    %c0_7 = arith.constant 0 : index
    %8 = vector.load %arg4[%c0_6, %c0_7] : memref<64x32xf32, #tpu.memory_space<vmem>>, vector<64x32xf32>
    %cst_8 = arith.constant dense<0.000000e+00> : vector<8x32xf32>
    %9 = tpu.matmul %7, %8, %cst_8 {dimension_numbers = #tpu.dot_dimension_numbers<[1], [0], [0], [1], [0, 0, 1, 1], [], []>} : vector<8x64xf32>, vector<64x32xf32>, vector<8x32xf32> -> vector<8x32xf32>
    %c0_9 = arith.constant 0 : index
    %c0_10 = arith.constant 0 : index
    %10 = vector.load %arg5[%c0_9, %c0_10] : memref<1x32xf32, #tpu.memory_space<vmem>>, vector<1x32xf32>
    %11 = vector.broadcast %10 : vector<1x32xf32> to vector<8x32xf32>
    %12 = arith.addf %9, %11 : vector<8x32xf32>
    %cst_11 = arith.constant 0.000000e+00 : f32
    %13 = vector.broadcast %cst_11 : f32 to vector<8x32xf32>
    %14 = arith.maximumf %12, %13 : vector<8x32xf32>
    %c0_12 = arith.constant 0 : index
    %c0_13 = arith.constant 0 : index
    %15 = vector.load %arg6[%c0_12, %c0_13] : memref<32x3xf32, #tpu.memory_space<vmem>>, vector<32x3xf32>
    %cst_14 = arith.constant dense<0.000000e+00> : vector<8x3xf32>
    %16 = tpu.matmul %14, %15, %cst_14 {dimension_numbers = #tpu.dot_dimension_numbers<[1], [0], [0], [1], [0, 0, 1, 1], [], []>} : vector<8x32xf32>, vector<32x3xf32>, vector<8x3xf32> -> vector<8x3xf32>
    %c0_15 = arith.constant 0 : index
    %c0_16 = arith.constant 0 : index
    %17 = vector.load %arg7[%c0_15, %c0_16] : memref<1x3xf32, #tpu.memory_space<vmem>>, vector<1x3xf32>
    %18 = vector.broadcast %17 : vector<1x3xf32> to vector<8x3xf32>
    %19 = arith.addf %16, %18 : vector<8x3xf32>
    %c0_17 = arith.constant 0 : index
    %c0_18 = arith.constant 0 : index
    %20 = vector.load %arg8[%c0_17, %c0_18] : memref<8x3xf32, #tpu.memory_space<vmem>>, vector<8x3xf32>
    tpu.vector_store %arg8[%c0_17, %c0_18], %19 {strides = array<i32>} : memref<8x3xf32, #tpu.memory_space<vmem>>, vector<8x3xf32>,
    return
  }
  func.func @transform_0(%arg0: i32) -> (i32, i32) {
    %c0_i32 = arith.constant 0 : i32
    %c0_i32_0 = arith.constant 0 : i32
    return %arg0, %c0_i32 : i32, i32
  }
  func.func @transform_1(%arg0: i32) -> (i32, i32) {
    %c0_i32 = arith.constant 0 : i32
    %c0_i32_0 = arith.constant 0 : i32
    %c0_i32_1 = arith.constant 0 : i32
    return %c0_i32, %c0_i32_0 : i32, i32
  }
  func.func @transform_2(%arg0: i32) -> (i32, i32) {
    %c0_i32 = arith.constant 0 : i32
    %c0_i32_0 = arith.constant 0 : i32
    %c0_i32_1 = arith.constant 0 : i32
    return %c0_i32, %c0_i32_0 : i32, i32
  }
  func.func @transform_3(%arg0: i32) -> (i32, i32) {
    %c0_i32 = arith.constant 0 : i32
    %c0_i32_0 = arith.constant 0 : i32
    %c0_i32_1 = arith.constant 0 : i32
    return %c0_i32, %c0_i32_0 : i32, i32
  }
  func.func @transform_4(%arg0: i32) -> (i32, i32) {
    %c0_i32 = arith.constant 0 : i32
    %c0_i32_0 = arith.constant 0 : i32
    %c0_i32_1 = arith.constant 0 : i32
    return %c0_i32, %c0_i32_0 : i32, i32
  }
  func.func @transform_5(%arg0: i32) -> (i32, i32) {
    %c0_i32 = arith.constant 0 : i32
    %c0_i32_0 = arith.constant 0 : i32
    %c0_i32_1 = arith.constant 0 : i32
    return %c0_i32, %c0_i32_0 : i32, i32
  }
  func.func @transform_6(%arg0: i32) -> (i32, i32) {
    %c0_i32 = arith.constant 0 : i32
    %c0_i32_0 = arith.constant 0 : i32
    %c0_i32_1 = arith.constant 0 : i32
    return %c0_i32, %c0_i32_0 : i32, i32
  }
  func.func @transform_7(%arg0: i32) -> (i32, i32) {
    %c0_i32 = arith.constant 0 : i32
    %c0_i32_0 = arith.constant 0 : i32
    return %arg0, %c0_i32 : i32, i32
  }
}

</mosaic_0001>

<bundles_post_ra>
// kernel: tpu_custom_call.1
= control target key start
LH: loop header
LB: loop body
LE: loop exit
PB: predicated region body
PF: predicated region fallthrough
CT: control target
= control target key end

     0   :  { %s739_s24 = smov 0   ;;  %s814_s0 = inlined_call_operand.vmem [shape: f32[16,6], index: 0, kind: input, shape index: {}]   ;;  %s815_s1 = inlined_call_operand.vmem [shape: f32[6,64], index: 1, kind: input, shape index: {}]   ;;  %s816_s2 = inlined_call_operand.vmem [shape: f32[1,64], index: 2, kind: input, shape index: {}]   ;;  %s817_s3 = inlined_call_operand.vmem [shape: f32[64,32], index: 3, kind: input, shape index: {}]   ;;  %s818_s4 = inlined_call_operand.vmem [shape: f32[1,32], index: 4, kind: input, shape index: {}]   ;;  %s819_s5 = inlined_call_operand.vmem [shape: f32[32,3], index: 5, kind: input, shape index: {}]   ;;  %s820_s6 = inlined_call_operand.vmem [shape: f32[1,3], index: 6, kind: input, shape index: {}]   ;;  %s821_s7 = inlined_call_operand.vmem [shape: f32[16,3], index: 7, kind: output, shape index: {}]  }
   0x1 LB: > { %s592_s25 = sadd.s32 4294967295, %s694_s24   ;;  %p596_p0 = scmp.ge.s32.totalorder %s694_s24, 1  ;;  %s694_s24 = sphi %s739_s24, %s17_s24  }
   0x2   : > { %p236_p1 = scmp.lt.s32.totalorder %s694_s24, 3 }
   0x4   : > { %p237_p2 = pnand %p596_p0, %p236_p1 }
   0x5   : > { %v275_v0 = vld [vmem:[%s815_s1] sm:$0x3f] (!%p237_p2)  ;;  %vm287_vm0 = vcmask (!%p237_p2), 1045504   ;;  %p266_p3 = scmp.lt.s32.totalorder (!%p237_p2), %s592_s25, 1  ;;  %v696_v1 = vmov (!%p237_p2), 0.0   ;;  %vm697_vm1 = vmmov (!%p237_p2), 0  }
   0x6   : > { %240 = sbr.rel (%p237_p2) target bundleno = 664 (0x298), region = 48  ;;  %624 = vmatprep.subr.mxu0 (!%p237_p2), %v696_v1  ;;  %626 = vmatprep.mubr.msk.f32.mxu0 (!%p237_p2), %vm697_vm1, %v696_v1  ;;  %v362_v2 = vld [vmem:[%s817_s3] sm:$0xff] (!%p237_p2)  ;;  %v363_v3 = vld [vmem:[%s817_s3 + $0x8] sm:$0xff] (!%p237_p2)  ;;  %v364_v4 = vld [vmem:[%s817_s3 + $0x10] sm:$0xff] (!%p237_p2)  ;;  %v698_v5 = vmov (!%p237_p2), 0.0|0.0   ;;  %vm283_vm2 = vcmask (!%p237_p2), 48128  }
   0x7   : > { %625 = vmatpush3.msk.msra.mxu0 (!%p237_p2), %vm287_vm0, %v275_v0  ;;  %659 = vmatprep.subr.bf16.mxu1 (!%p237_p2), %v698_v5  ;;  %v660_v6 = vpack.c.bf16 (!%p237_p2), %v363_v3, %v362_v2  ;;  %v365_v7 = vld [vmem:[%s817_s3 + $0x18] sm:$0xff] (!%p237_p2)  ;;  %v366_v9 = vld [vmem:[%s817_s3 + $0x20] sm:$0xff] (!%p237_p2)  ;;  %v367_v10 = vld [vmem:[%s817_s3 + $0x28] sm:$0xff] (!%p237_p2)  ;;  %vm377_vm3 = vcmask (!%p237_p2), 523264   ;;  %vm463_vm4 = vcmask (!%p237_p2), 261120   ;;  %vm537_vm5 = vcmask (!%p237_p2), 23552  }
   0x8   : > { %645 = vmatprep.mubr.msk.f32.mxu1 (!%p237_p2), %vm697_vm1, %v696_v1  ;;  %671 = vmatprep.subr.bf16.mxu0 (!%p237_p2), %v698_v5  ;;  %v663_v8 = vpack.c.bf16 (!%p237_p2), %v365_v7, %v364_v4  ;;  %v666_v12 = vpack.c.bf16 (!%p237_p2), %v367_v10, %v366_v9  ;;  %v368_v13 = vld [vmem:[%s817_s3 + $0x30] sm:$0xff] (!%p237_p2)  ;;  %v369_v14 = vld [vmem:[%s817_s3 + $0x38] sm:$0xff] (!%p237_p2)  ;;  %v452_v16 = vld [vmem:[%s819_s5] sm:$0xff] (!%p237_p2) }
   0x9   : > { %661 = vmatpush3.bf16.msra.mxu1 (!%p237_p2), %v660_v6  ;;  %v669_v15 = vpack.c.bf16 (!%p237_p2), %v369_v14, %v368_v13  ;;  %v453_v17 = vld [vmem:[%s819_s5 + $0x8] sm:$0xff] (!%p237_p2)  ;;  %v599_v19 = vld [vmem:[%s816_s2] ss:$0 sm:$0xff] (!%p237_p2)  ;;  %v454_v24 = vld [vmem:[%s819_s5 + $0x10] sm:$0xff] (!%p237_p2) }
   0xa   : > { %662 = vmatprep.subr.bf16.mxu1 (!%p237_p2), %v698_v5  ;;  %v672_v18 = vpack.c.bf16 (!%p237_p2), %v453_v17, %v452_v16  ;;  %v455_v25 = vld [vmem:[%s819_s5 + $0x18] sm:$0xff] (!%p237_p2)  ;;  %v602_v27 = vld [vmem:[%s818_s4] ss:$0 sm:$0xff] (!%p237_p2) }
   0xb   : > { %v675_v26 = vpack.c.bf16 (!%p237_p2), %v455_v25, %v454_v24  ;;  %v604_v32 = vld [vmem:[%s820_s6] ss:$0 sm:$0xff] (!%p237_p2) }
   0xd   : > { %s823_s25 = smov (!%p266_p3, %s592_s25), 1  ;;  %664 = vmatpush3.bf16.msra.mxu1 %v663_v8 }
   0xe   : > { %s597_s13 = sshll.u32 %s823_s25, 3  ;;  %665 = vmatprep.subr.bf16.mxu1 %v698_v5 }
   0xf   : > { %s269_s16 = scalar_lea.vmem %s814_s0, %s597_s13  ;;  %s273_s21 = scalar_lea.vmem %s821_s7, %s597_s13 }
  0x10   : > { %v274_v11 = vld [vmem:[%s269_s16] sm:$0xff] }
  0x11   : > { %627 = vmatmul.mubr.msk.f32.vlgmr.msra.gmra.mrb[0].mxu0 %vm283_vm2, %v274_v11  ;;  %667 = vmatpush3.bf16.msra.mxu1 %v666_v12 }
  0x12   : > { %656 = vmatprep.mubr.msk.f32.mxu0 %vm697_vm1, %v696_v1  ;;  %668 = vmatprep.subr.bf16.mxu1 %v698_v5 }
  0x13   : > { %673 = vmatpush3.bf16.msra.mxu0 %v672_v18 }
  0x14   : > { %674 = vmatprep.subr.bf16.mxu0 %v698_v5 }
  0x15   : > { %670 = vmatpush3.bf16.msra.mxu1 %v669_v15 }
  0x17   : > { %676 = vmatpush3.bf16.msra.mxu0 %v675_v26 }
  0xe4   : > { %v357_v20 = vpop.f32.mrb[0].mxu0 }
  0xe5   : > { %v358_v21 = vadd.f32 %v599_v19, %v357_v20  ;;  %v628_v22 = vpop.f32.mrb[1].mxu0 }
  0xe7   : > { %v361_v23 = vmax.f32 %v358_v21, 0.0 }
  0xe9   : > { %646 = vmatmul.mubr.msk.f32.vlgmr.msra.gmra.mrb[0].mxu1 %vm377_vm3, %v361_v23 }
 0x1bc   : > { %v447_v28 = vpop.f32.mrb[0].mxu1 }
 0x1bd   : > { %v448_v29 = vadd.f32 %v602_v27, %v447_v28  ;;  %v647_v30 = vpop.f32.mrb[1].mxu1 }
 0x1bf   : > { %v451_v31 = vmax.f32 %v448_v29, 0.0 }
 0x1c1   : > { %657 = vmatmul.mubr.msk.f32.vlgmr.msra.gmra.mrb[2].mxu0 %vm463_vm4, %v451_v31 }
 0x294   : > { %v533_v33 = vpop.f32.mrb[2].mxu0 }
 0x295   : > { %v534_v34 = vadd.f32 %v604_v32, %v533_v33  ;;  %v658_v35 = vpop.f32.mrb[3].mxu0 }
 0x297   : > { %538 = vst.msk [vmem:[%s273_s21] sm:$0xff] %vm537_vm5, %v534_v34 }
 0x298 PF: > { %s17_s24 = sadd.s32 1, %s694_s24  }
 0x299   : > { %p14_p4 = scmp.ge.s32.totalorder %s17_s24, 4  }
 0x29b   :  { %16 = sbr.rel (!%p14_p4) target bundleno = 1 (0x1), region = 78 }

</bundles_post_ra>
